<compile_context>
chip_gen: v7x
topology: tpu7x:2x2x1
jax: 0.10.0
libtpu: 0.0.40
codegen_flags: <defaults>
</compile_context>

<pallas_src>
import jax
import jax.numpy as jnp
from jax.experimental import pallas as pl
from jax.experimental.pallas import tpu as pltpu

EPS = 1e-5


def residual_block(x_nchw, params):
    B, C, H, W = x_nchw.shape
    NPIX = B * H * W
    CPAD = ((C + 7) // 8) * 8          # sublane-tile-aligned channel count

    def kernel(x_ref, m_ref, w1_ref, w2_ref,
               g1_ref, b1_ref, g2_ref, b2_ref,
               o_ref, p_ref):
        f32 = jnp.float32
        inv_n = 1.0 / NPIX

        def batchnorm(h, g, b):
            # Fused single-pass stats (sum & sum-of-squares), then var =
            # E[x^2] - E[x]^2; rsqrt goes to the EUP slot.  Padded channel
            # rows are all-zero and gamma/beta are zero-padded, so they stay 0.
            # TODO(synk): switch to two-pass/shifted stats for the realistic
            # tiled version (catastrophic cancellation risk at large |mean|).
            s = jnp.sum(h, axis=1, keepdims=True)          # (CPAD, 1)
            ss = jnp.sum(h * h, axis=1, keepdims=True)     # (CPAD, 1)
            mean = s * inv_n
            var = ss * inv_n - mean * mean
            scale = g * jax.lax.rsqrt(var + EPS)           # (CPAD, 1)
            shift = b - mean * scale                       # (CPAD, 1)
            return h * scale + shift                       # one broadcast FMA

        def conv3x3(h, w_ref):
            # h: (CPAD, NPIX) register-resident activation.
            # Build (9*CPAD, NPIX) patches with one XLU roll + one broadcast
            # multiply + one fully aligned vst per tap, then a single dense
            # MXU matmul (CPAD, 9*CPAD) @ (9*CPAD, NPIX).
            for t in range(9):
                dh, dw = t // 3 - 1, t % 3 - 1
                s = dh * W + dw
                # want win[:, p] = h[:, p + s]  (np.roll convention => -s)
                win = h if s == 0 else pltpu.roll(h, shift=(-s) % NPIX, axis=1)
                # wrap-around / out-of-image pixels zeroed by the 0/1 mask
                p_ref[t * CPAD:(t + 1) * CPAD, :] = win * m_ref[t:t + 1, :]
            return jnp.dot(w_ref[...], p_ref[...], preferred_element_type=f32)

        x = x_ref[...]                                     # (CPAD, NPIX)

        # ---- conv1 -> BN1 -> ReLU ----------------------------------------
        h1 = conv3x3(x, w1_ref)
        h1 = jnp.maximum(batchnorm(h1, g1_ref[...], b1_ref[...]), 0.0)

        # ---- conv2 -> BN2 -> +shortcut -> ReLU ----------------------------
        h2 = conv3x3(h1, w2_ref)                           # reuses p_ref scratch
        h2 = batchnorm(h2, g2_ref[...], b2_ref[...])
        o_ref[...] = jnp.maximum(h2 + x, 0.0)              # aligned (CPAD, NPIX) store

    # ---------------- wrapper-side layout plumbing (plain XLA) --------------
    # Activation: NCHW -> (C, B*H*W), zero-padded to CPAD sublanes.
    x_cn = jnp.pad(x_nchw.transpose(1, 0, 2, 3).reshape(C, NPIX),
                   ((0, CPAD - C), (0, 0)))

    # Conv weights: OIHW -> (co, (kh, kw, ci)) with both co and ci zero-padded
    # to CPAD, matching the 8-sublane tap-slab layout of the patch scratch.
    def to_mat(w):
        w_t = jnp.transpose(w, (0, 2, 3, 1))                       # (co,kh,kw,ci)
        w_t = jnp.pad(w_t, ((0, CPAD - C), (0, 0), (0, 0), (0, CPAD - C)))
        return w_t.reshape(CPAD, 9 * CPAD)

    w1_mat = to_mat(params["w1"])
    w2_mat = to_mat(params["w2"])

    def pad_cn(v):
        return jnp.pad(v, (0, CPAD - C)).reshape(CPAD, 1)

    g1, b1 = pad_cn(params["gamma1"]), pad_cn(params["beta1"])
    g2, b2 = pad_cn(params["gamma2"]), pad_cn(params["beta2"])

    # 9 precomputed 0/1 validity masks (same geometry for both convs);
    # tap order t = (dh+1)*3 + (dw+1) matches the kernel's tap loop.
    pix = jnp.arange(NPIX, dtype=jnp.int32)
    hh = (pix // W) % H
    ww = pix % W
    masks = jnp.stack(
        [((hh + dh >= 0) & (hh + dh < H) &
          (ww + dw >= 0) & (ww + dw < W)).astype(jnp.float32)
         for dh in (-1, 0, 1) for dw in (-1, 0, 1)], axis=0)        # (9, NPIX)

    vmem = pltpu.MemorySpace.VMEM
    y = pl.pallas_call(
        kernel,
        out_shape=jax.ShapeDtypeStruct((CPAD, NPIX), jnp.float32),
        in_specs=[pl.BlockSpec(memory_space=vmem)] * 8,
        out_specs=pl.BlockSpec(memory_space=vmem),
        scratch_shapes=[pltpu.VMEM((9 * CPAD, NPIX), jnp.float32)],  # patch slabs
        compiler_params=pltpu.CompilerParams(
            vmem_limit_bytes=32 * 1024 * 1024),
    )(x_cn, masks, w1_mat, w2_mat, g1, b1, g2, b2)

    # TODO(synk): when chaining blocks, keep the channel-major (C, NPIX) layout
    # between blocks instead of paying this relayout per block.
    return y[:C].reshape(C, B, H, W).transpose(1, 0, 2, 3)


def reference_forward(x, params):
    # pure-JAX reference (NCHW, like the PyTorch module) for a correctness check
    def conv(h, w):
        return jax.lax.conv_general_dilated(
            h, w, (1, 1), "SAME", dimension_numbers=("NCHW", "OIHW", "NCHW"))

    def bn(h, g, b):
        mean = jnp.mean(h, axis=(0, 2, 3), keepdims=True)
        var = jnp.mean((h - mean) ** 2, axis=(0, 2, 3), keepdims=True)
        return ((h - mean) / jnp.sqrt(var + EPS) * g.reshape(1, -1, 1, 1)
                + b.reshape(1, -1, 1, 1))

    h = jax.nn.relu(bn(conv(x, params["w1"]), params["gamma1"], params["beta1"]))
    h = bn(conv(h, params["w2"]), params["gamma2"], params["beta2"])
    return jax.nn.relu(h + x)


if __name__ == "__main__":
    B, C, H, W = 2, 4, 16, 16  # num_filters = 4

    key = jax.random.PRNGKey(0)
    kx, kw1, kw2 = jax.random.split(key, 3)

    x = jax.random.normal(kx, (B, C, H, W), dtype=jnp.float32)

    # deterministic parameter init (conv: OIHW like PyTorch; BN: gamma=1, beta=0)
    scale = 1.0 / jnp.sqrt(C * 9.0)
    params = {
        "w1": scale * jax.random.normal(kw1, (C, C, 3, 3), dtype=jnp.float32),
        "w2": scale * jax.random.normal(kw2, (C, C, 3, 3), dtype=jnp.float32),
        "gamma1": jnp.ones((C,), jnp.float32),
        "beta1": jnp.zeros((C,), jnp.float32),
        "gamma2": jnp.ones((C,), jnp.float32),
        "beta2": jnp.zeros((C,), jnp.float32),
    }

    out = residual_block(x, params)
    out = jax.block_until_ready(out)

    ref = jax.block_until_ready(reference_forward(x, params))
    assert out.shape == (B, C, H, W)
    assert jnp.allclose(out, ref, atol=1e-4, rtol=1e-4), "mismatch vs JAX reference"

    print("KERNEL_OK")
</pallas_src>

<mosaic_0001>
module attributes {stable_mosaic.version = 11 : i64} {
  func.func @kernel(%arg0: memref<8x512xf32, #tpu.memory_space<vmem>>, %arg1: memref<9x512xf32, #tpu.memory_space<vmem>>, %arg2: memref<8x72xf32, #tpu.memory_space<vmem>>, %arg3: memref<8x72xf32, #tpu.memory_space<vmem>>, %arg4: memref<8x1xf32, #tpu.memory_space<vmem>>, %arg5: memref<8x1xf32, #tpu.memory_space<vmem>>, %arg6: memref<8x1xf32, #tpu.memory_space<vmem>>, %arg7: memref<8x1xf32, #tpu.memory_space<vmem>>, %arg8: memref<8x512xf32, #tpu.memory_space<vmem>>, %arg9: memref<72x512xf32, #tpu.memory_space<vmem>>) attributes {dimension_semantics = [], scalar_prefetch = 0 : i64, scratch_operands = 1 : i64, tpu.core_type = #tpu.core_type<tc>} {
    %c0 = arith.constant 0 : index
    %c0_0 = arith.constant 0 : index
    %0 = vector.load %arg0[%c0, %c0_0] : memref<8x512xf32, #tpu.memory_space<vmem>>, vector<8x512xf32>
    %c17_i32 = arith.constant 17 : i32
    %1 = tpu.dynamic_rotate %0 by %c17_i32 dim 1 : vector<8x512xf32>, i32 -> vector<8x512xf32>
    %c0_1 = arith.constant 0 : index
    %c0_2 = arith.constant 0 : index
    %2 = vector.load %arg1[%c0_1, %c0_2] : memref<9x512xf32, #tpu.memory_space<vmem>>, vector<1x512xf32>
    %3 = vector.broadcast %2 : vector<1x512xf32> to vector<8x512xf32>
    %4 = arith.mulf %1, %3 : vector<8x512xf32>
    %c0_3 = arith.constant 0 : index
    %c0_4 = arith.constant 0 : index
    %5 = vector.load %arg9[%c0_3, %c0_4] : memref<72x512xf32, #tpu.memory_space<vmem>>, vector<8x512xf32>
    tpu.vector_store %arg9[%c0_3, %c0_4], %4 {strides = array<i32>} : memref<72x512xf32, #tpu.memory_space<vmem>>, vector<8x512xf32>,
    %c16_i32 = arith.constant 16 : i32
    %6 = tpu.dynamic_rotate %0 by %c16_i32 dim 1 : vector<8x512xf32>, i32 -> vector<8x512xf32>
    %c1 = arith.constant 1 : index
    %c0_5 = arith.constant 0 : index
    %7 = vector.load %arg1[%c1, %c0_5] : memref<9x512xf32, #tpu.memory_space<vmem>>, vector<1x512xf32>
    %8 = vector.broadcast %7 : vector<1x512xf32> to vector<8x512xf32>
    %9 = arith.mulf %6, %8 : vector<8x512xf32>
    %c8 = arith.constant 8 : index
    %c0_6 = arith.constant 0 : index
    %10 = vector.load %arg9[%c8, %c0_6] : memref<72x512xf32, #tpu.memory_space<vmem>>, vector<8x512xf32>
    tpu.vector_store %arg9[%c8, %c0_6], %9 {strides = array<i32>} : memref<72x512xf32, #tpu.memory_space<vmem>>, vector<8x512xf32>,
    %c15_i32 = arith.constant 15 : i32
    %11 = tpu.dynamic_rotate %0 by %c15_i32 dim 1 : vector<8x512xf32>, i32 -> vector<8x512xf32>
    %c2 = arith.constant 2 : index
    %c0_7 = arith.constant 0 : index
    %12 = vector.load %arg1[%c2, %c0_7] : memref<9x512xf32, #tpu.memory_space<vmem>>, vector<1x512xf32>
    %13 = vector.broadcast %12 : vector<1x512xf32> to vector<8x512xf32>
    %14 = arith.mulf %11, %13 : vector<8x512xf32>
    %c16 = arith.constant 16 : index
    %c0_8 = arith.constant 0 : index
    %15 = vector.load %arg9[%c16, %c0_8] : memref<72x512xf32, #tpu.memory_space<vmem>>, vector<8x512xf32>
    tpu.vector_store %arg9[%c16, %c0_8], %14 {strides = array<i32>} : memref<72x512xf32, #tpu.memory_space<vmem>>, vector<8x512xf32>,
    %c1_i32 = arith.constant 1 : i32
    %16 = tpu.dynamic_rotate %0 by %c1_i32 dim 1 : vector<8x512xf32>, i32 -> vector<8x512xf32>
    %c3 = arith.constant 3 : index
    %c0_9 = arith.constant 0 : index
    %17 = vector.load %arg1[%c3, %c0_9] : memref<9x512xf32, #tpu.memory_space<vmem>>, vector<1x512xf32>
    %18 = vector.broadcast %17 : vector<1x512xf32> to vector<8x512xf32>
    %19 = arith.mulf %16, %18 : vector<8x512xf32>
    %c24 = arith.constant 24 : index
    %c0_10 = arith.constant 0 : index
    %20 = vector.load %arg9[%c24, %c0_10] : memref<72x512xf32, #tpu.memory_space<vmem>>, vector<8x512xf32>
    tpu.vector_store %arg9[%c24, %c0_10], %19 {strides = array<i32>} : memref<72x512xf32, #tpu.memory_space<vmem>>, vector<8x512xf32>,
    %c4 = arith.constant 4 : index
    %c0_11 = arith.constant 0 : index
    %21 = vector.load %arg1[%c4, %c0_11] : memref<9x512xf32, #tpu.memory_space<vmem>>, vector<1x512xf32>
    %22 = vector.broadcast %21 : vector<1x512xf32> to vector<8x512xf32>
    %23 = arith.mulf %0, %22 : vector<8x512xf32>
    %c32 = arith.constant 32 : index
    %c0_12 = arith.constant 0 : index
    %24 = vector.load %arg9[%c32, %c0_12] : memref<72x512xf32, #tpu.memory_space<vmem>>, vector<8x512xf32>
    tpu.vector_store %arg9[%c32, %c0_12], %23 {strides = array<i32>} : memref<72x512xf32, #tpu.memory_space<vmem>>, vector<8x512xf32>,
    %c511_i32 = arith.constant 511 : i32
    %25 = tpu.dynamic_rotate %0 by %c511_i32 dim 1 : vector<8x512xf32>, i32 -> vector<8x512xf32>
    %c5 = arith.constant 5 : index
    %c0_13 = arith.constant 0 : index
    %26 = vector.load %arg1[%c5, %c0_13] : memref<9x512xf32, #tpu.memory_space<vmem>>, vector<1x512xf32>
    %27 = vector.broadcast %26 : vector<1x512xf32> to vector<8x512xf32>
    %28 = arith.mulf %25, %27 : vector<8x512xf32>
    %c40 = arith.constant 40 : index
    %c0_14 = arith.constant 0 : index
    %29 = vector.load %arg9[%c40, %c0_14] : memref<72x512xf32, #tpu.memory_space<vmem>>, vector<8x512xf32>
    tpu.vector_store %arg9[%c40, %c0_14], %28 {strides = array<i32>} : memref<72x512xf32, #tpu.memory_space<vmem>>, vector<8x512xf32>,
    %c497_i32 = arith.constant 497 : i32
    %30 = tpu.dynamic_rotate %0 by %c497_i32 dim 1 : vector<8x512xf32>, i32 -> vector<8x512xf32>
    %c6 = arith.constant 6 : index
    %c0_15 = arith.constant 0 : index
    %31 = vector.load %arg1[%c6, %c0_15] : memref<9x512xf32, #tpu.memory_space<vmem>>, vector<1x512xf32>
    %32 = vector.broadcast %31 : vector<1x512xf32> to vector<8x512xf32>
    %33 = arith.mulf %30, %32 : vector<8x512xf32>
    %c48 = arith.constant 48 : index
    %c0_16 = arith.constant 0 : index
    %34 = vector.load %arg9[%c48, %c0_16] : memref<72x512xf32, #tpu.memory_space<vmem>>, vector<8x512xf32>
    tpu.vector_store %arg9[%c48, %c0_16], %33 {strides = array<i32>} : memref<72x512xf32, #tpu.memory_space<vmem>>, vector<8x512xf32>,
    %c496_i32 = arith.constant 496 : i32
    %35 = tpu.dynamic_rotate %0 by %c496_i32 dim 1 : vector<8x512xf32>, i32 -> vector<8x512xf32>
    %c7 = arith.constant 7 : index
    %c0_17 = arith.constant 0 : index
    %36 = vector.load %arg1[%c7, %c0_17] : memref<9x512xf32, #tpu.memory_space<vmem>>, vector<1x512xf32>
    %37 = vector.broadcast %36 : vector<1x512xf32> to vector<8x512xf32>
    %38 = arith.mulf %35, %37 : vector<8x512xf32>
    %c56 = arith.constant 56 : index
    %c0_18 = arith.constant 0 : index
    %39 = vector.load %arg9[%c56, %c0_18] : memref<72x512xf32, #tpu.memory_space<vmem>>, vector<8x512xf32>
    tpu.vector_store %arg9[%c56, %c0_18], %38 {strides = array<i32>} : memref<72x512xf32, #tpu.memory_space<vmem>>, vector<8x512xf32>,
    %c495_i32 = arith.constant 495 : i32
    %40 = tpu.dynamic_rotate %0 by %c495_i32 dim 1 : vector<8x512xf32>, i32 -> vector<8x512xf32>
    %c8_19 = arith.constant 8 : index
    %c0_20 = arith.constant 0 : index
    %41 = vector.load %arg1[%c8_19, %c0_20] : memref<9x512xf32, #tpu.memory_space<vmem>>, vector<1x512xf32>
    %42 = vector.broadcast %41 : vector<1x512xf32> to vector<8x512xf32>
    %43 = arith.mulf %40, %42 : vector<8x512xf32>
    %c64 = arith.constant 64 : index
    %c0_21 = arith.constant 0 : index
    %44 = vector.load %arg9[%c64, %c0_21] : memref<72x512xf32, #tpu.memory_space<vmem>>, vector<8x512xf32>
    tpu.vector_store %arg9[%c64, %c0_21], %43 {strides = array<i32>} : memref<72x512xf32, #tpu.memory_space<vmem>>, vector<8x512xf32>,
    %c0_22 = arith.constant 0 : index
    %c0_23 = arith.constant 0 : index
    %45 = vector.load %arg2[%c0_22, %c0_23] : memref<8x72xf32, #tpu.memory_space<vmem>>, vector<8x72xf32>
    %c0_24 = arith.constant 0 : index
    %c0_25 = arith.constant 0 : index
    %46 = vector.load %arg9[%c0_24, %c0_25] : memref<72x512xf32, #tpu.memory_space<vmem>>, vector<72x512xf32>
    %cst = arith.constant dense<0.000000e+00> : vector<8x512xf32>
    %47 = tpu.matmul %45, %46, %cst {dimension_numbers = #tpu.dot_dimension_numbers<[1], [0], [0], [1], [0, 0, 1, 1], [], []>} : vector<8x72xf32>, vector<72x512xf32>, vector<8x512xf32> -> vector<8x512xf32>
    %c0_26 = arith.constant 0 : index
    %c0_27 = arith.constant 0 : index
    %48 = vector.load %arg4[%c0_26, %c0_27] : memref<8x1xf32, #tpu.memory_space<vmem>>, vector<8x1xf32>
    %c0_28 = arith.constant 0 : index
    %c0_29 = arith.constant 0 : index
    %49 = vector.load %arg5[%c0_28, %c0_29] : memref<8x1xf32, #tpu.memory_space<vmem>>, vector<8x1xf32>
    %cst_30 = arith.constant dense<0.000000e+00> : vector<8xf32>
    %50 = vector.multi_reduction <add>, %47, %cst_30 [1] : vector<8x512xf32> to vector<8xf32>
    %51 = vector.shape_cast %50 : vector<8xf32> to vector<8x1xf32>
    %52 = arith.mulf %47, %47 : vector<8x512xf32>
    %cst_31 = arith.constant dense<0.000000e+00> : vector<8xf32>
    %53 = vector.multi_reduction <add>, %52, %cst_31 [1] : vector<8x512xf32> to vector<8xf32>
    %54 = vector.shape_cast %53 : vector<8xf32> to vector<8x1xf32>
    %cst_32 = arith.constant 0.001953125 : f32
    %55 = vector.broadcast %cst_32 : f32 to vector<8x1xf32>
    %56 = arith.mulf %51, %55 : vector<8x1xf32>
    %cst_33 = arith.constant 0.001953125 : f32
    %57 = vector.broadcast %cst_33 : f32 to vector<8x1xf32>
    %58 = arith.mulf %54, %57 : vector<8x1xf32>
    %59 = arith.mulf %56, %56 : vector<8x1xf32>
    %60 = arith.subf %58, %59 : vector<8x1xf32>
    %cst_34 = arith.constant 9.99999974E-6 : f32
    %61 = vector.broadcast %cst_34 : f32 to vector<8x1xf32>
    %62 = arith.addf %60, %61 : vector<8x1xf32>
    %63 = math.rsqrt %62 : vector<8x1xf32>
    %64 = arith.mulf %48, %63 : vector<8x1xf32>
    %65 = arith.mulf %56, %64 : vector<8x1xf32>
    %66 = arith.subf %49, %65 : vector<8x1xf32>
    %67 = vector.broadcast %64 : vector<8x1xf32> to vector<8x512xf32>
    %68 = arith.mulf %47, %67 : vector<8x512xf32>
    %69 = vector.broadcast %66 : vector<8x1xf32> to vector<8x512xf32>
    %70 = arith.addf %68, %69 : vector<8x512xf32>
    %cst_35 = arith.constant 0.000000e+00 : f32
    %71 = vector.broadcast %cst_35 : f32 to vector<8x512xf32>
    %72 = arith.maximumf %70, %71 : vector<8x512xf32>
    %c17_i32_36 = arith.constant 17 : i32
    %73 = tpu.dynamic_rotate %72 by %c17_i32_36 dim 1 : vector<8x512xf32>, i32 -> vector<8x512xf32>
    %c0_37 = arith.constant 0 : index
    %c0_38 = arith.constant 0 : index
    %74 = vector.load %arg1[%c0_37, %c0_38] : memref<9x512xf32, #tpu.memory_space<vmem>>, vector<1x512xf32>
    %75 = vector.broadcast %74 : vector<1x512xf32> to vector<8x512xf32>
    %76 = arith.mulf %73, %75 : vector<8x512xf32>
    %c0_39 = arith.constant 0 : index
    %c0_40 = arith.constant 0 : index
    %77 = vector.load %arg9[%c0_39, %c0_40] : memref<72x512xf32, #tpu.memory_space<vmem>>, vector<8x512xf32>
    tpu.vector_store %arg9[%c0_39, %c0_40], %76 {strides = array<i32>} : memref<72x512xf32, #tpu.memory_space<vmem>>, vector<8x512xf32>,
    %c16_i32_41 = arith.constant 16 : i32
    %78 = tpu.dynamic_rotate %72 by %c16_i32_41 dim 1 : vector<8x512xf32>, i32 -> vector<8x512xf32>
    %c1_42 = arith.constant 1 : index
    %c0_43 = arith.constant 0 : index
    %79 = vector.load %arg1[%c1_42, %c0_43] : memref<9x512xf32, #tpu.memory_space<vmem>>, vector<1x512xf32>
    %80 = vector.broadcast %79 : vector<1x512xf32> to vector<8x512xf32>
    %81 = arith.mulf %78, %80 : vector<8x512xf32>
    %c8_44 = arith.constant 8 : index
    %c0_45 = arith.constant 0 : index
    %82 = vector.load %arg9[%c8_44, %c0_45] : memref<72x512xf32, #tpu.memory_space<vmem>>, vector<8x512xf32>
    tpu.vector_store %arg9[%c8_44, %c0_45], %81 {strides = array<i32>} : memref<72x512xf32, #tpu.memory_space<vmem>>, vector<8x512xf32>,
    %c15_i32_46 = arith.constant 15 : i32
    %83 = tpu.dynamic_rotate %72 by %c15_i32_46 dim 1 : vector<8x512xf32>, i32 -> vector<8x512xf32>
    %c2_47 = arith.constant 2 : index
    %c0_48 = arith.constant 0 : index
    %84 = vector.load %arg1[%c2_47, %c0_48] : memref<9x512xf32, #tpu.memory_space<vmem>>, vector<1x512xf32>
    %85 = vector.broadcast %84 : vector<1x512xf32> to vector<8x512xf32>
    %86 = arith.mulf %83, %85 : vector<8x512xf32>
    %c16_49 = arith.constant 16 : index
    %c0_50 = arith.constant 0 : index
    %87 = vector.load %arg9[%c16_49, %c0_50] : memref<72x512xf32, #tpu.memory_space<vmem>>, vector<8x512xf32>
    tpu.vector_store %arg9[%c16_49, %c0_50], %86 {strides = array<i32>} : memref<72x512xf32, #tpu.memory_space<vmem>>, vector<8x512xf32>,
    %c1_i32_51 = arith.constant 1 : i32
    %88 = tpu.dynamic_rotate %72 by %c1_i32_51 dim 1 : vector<8x512xf32>, i32 -> vector<8x512xf32>
    %c3_52 = arith.constant 3 : index
    %c0_53 = arith.constant 0 : index
    %89 = vector.load %arg1[%c3_52, %c0_53] : memref<9x512xf32, #tpu.memory_space<vmem>>, vector<1x512xf32>
    %90 = vector.broadcast %89 : vector<1x512xf32> to vector<8x512xf32>
    %91 = arith.mulf %88, %90 : vector<8x512xf32>
    %c24_54 = arith.constant 24 : index
    %c0_55 = arith.constant 0 : index
    %92 = vector.load %arg9[%c24_54, %c0_55] : memref<72x512xf32, #tpu.memory_space<vmem>>, vector<8x512xf32>
    tpu.vector_store %arg9[%c24_54, %c0_55], %91 {strides = array<i32>} : memref<72x512xf32, #tpu.memory_space<vmem>>, vector<8x512xf32>,
    %c4_56 = arith.constant 4 : index
    %c0_57 = arith.constant 0 : index
    %93 = vector.load %arg1[%c4_56, %c0_57] : memref<9x512xf32, #tpu.memory_space<vmem>>, vector<1x512xf32>
    %94 = vector.broadcast %93 : vector<1x512xf32> to vector<8x512xf32>
    %95 = arith.mulf %72, %94 : vector<8x512xf32>
    %c32_58 = arith.constant 32 : index
    %c0_59 = arith.constant 0 : index
    %96 = vector.load %arg9[%c32_58, %c0_59] : memref<72x512xf32, #tpu.memory_space<vmem>>, vector<8x512xf32>
    tpu.vector_store %arg9[%c32_58, %c0_59], %95 {strides = array<i32>} : memref<72x512xf32, #tpu.memory_space<vmem>>, vector<8x512xf32>,
    %c511_i32_60 = arith.constant 511 : i32
    %97 = tpu.dynamic_rotate %72 by %c511_i32_60 dim 1 : vector<8x512xf32>, i32 -> vector<8x512xf32>
    %c5_61 = arith.constant 5 : index
    %c0_62 = arith.constant 0 : index
    %98 = vector.load %arg1[%c5_61, %c0_62] : memref<9x512xf32, #tpu.memory_space<vmem>>, vector<1x512xf32>
    %99 = vector.broadcast %98 : vector<1x512xf32> to vector<8x512xf32>
    %100 = arith.mulf %97, %99 : vector<8x512xf32>
    %c40_63 = arith.constant 40 : index
    %c0_64 = arith.constant 0 : index
    %101 = vector.load %arg9[%c40_63, %c0_64] : memref<72x512xf32, #tpu.memory_space<vmem>>, vector<8x512xf32>
    tpu.vector_store %arg9[%c40_63, %c0_64], %100 {strides = array<i32>} : memref<72x512xf32, #tpu.memory_space<vmem>>, vector<8x512xf32>,
    %c497_i32_65 = arith.constant 497 : i32
    %102 = tpu.dynamic_rotate %72 by %c497_i32_65 dim 1 : vector<8x512xf32>, i32 -> vector<8x512xf32>
    %c6_66 = arith.constant 6 : index
    %c0_67 = arith.constant 0 : index
    %103 = vector.load %arg1[%c6_66, %c0_67] : memref<9x512xf32, #tpu.memory_space<vmem>>, vector<1x512xf32>
    %104 = vector.broadcast %103 : vector<1x512xf32> to vector<8x512xf32>
    %105 = arith.mulf %102, %104 : vector<8x512xf32>
    %c48_68 = arith.constant 48 : index
    %c0_69 = arith.constant 0 : index
    %106 = vector.load %arg9[%c48_68, %c0_69] : memref<72x512xf32, #tpu.memory_space<vmem>>, vector<8x512xf32>
    tpu.vector_store %arg9[%c48_68, %c0_69], %105 {strides = array<i32>} : memref<72x512xf32, #tpu.memory_space<vmem>>, vector<8x512xf32>,
    %c496_i32_70 = arith.constant 496 : i32
    %107 = tpu.dynamic_rotate %72 by %c496_i32_70 dim 1 : vector<8x512xf32>, i32 -> vector<8x512xf32>
    %c7_71 = arith.constant 7 : index
    %c0_72 = arith.constant 0 : index
    %108 = vector.load %arg1[%c7_71, %c0_72] : memref<9x512xf32, #tpu.memory_space<vmem>>, vector<1x512xf32>
    %109 = vector.broadcast %108 : vector<1x512xf32> to vector<8x512xf32>
    %110 = arith.mulf %107, %109 : vector<8x512xf32>
    %c56_73 = arith.constant 56 : index
    %c0_74 = arith.constant 0 : index
    %111 = vector.load %arg9[%c56_73, %c0_74] : memref<72x512xf32, #tpu.memory_space<vmem>>, vector<8x512xf32>
    tpu.vector_store %arg9[%c56_73, %c0_74], %110 {strides = array<i32>} : memref<72x512xf32, #tpu.memory_space<vmem>>, vector<8x512xf32>,
    %c495_i32_75 = arith.constant 495 : i32
    %112 = tpu.dynamic_rotate %72 by %c495_i32_75 dim 1 : vector<8x512xf32>, i32 -> vector<8x512xf32>
    %c8_76 = arith.constant 8 : index
    %c0_77 = arith.constant 0 : index
    %113 = vector.load %arg1[%c8_76, %c0_77] : memref<9x512xf32, #tpu.memory_space<vmem>>, vector<1x512xf32>
    %114 = vector.broadcast %113 : vector<1x512xf32> to vector<8x512xf32>
    %115 = arith.mulf %112, %114 : vector<8x512xf32>
    %c64_78 = arith.constant 64 : index
    %c0_79 = arith.constant 0 : index
    %116 = vector.load %arg9[%c64_78, %c0_79] : memref<72x512xf32, #tpu.memory_space<vmem>>, vector<8x512xf32>
    tpu.vector_store %arg9[%c64_78, %c0_79], %115 {strides = array<i32>} : memref<72x512xf32, #tpu.memory_space<vmem>>, vector<8x512xf32>,
    %c0_80 = arith.constant 0 : index
    %c0_81 = arith.constant 0 : index
    %117 = vector.load %arg3[%c0_80, %c0_81] : memref<8x72xf32, #tpu.memory_space<vmem>>, vector<8x72xf32>
    %c0_82 = arith.constant 0 : index
    %c0_83 = arith.constant 0 : index
    %118 = vector.load %arg9[%c0_82, %c0_83] : memref<72x512xf32, #tpu.memory_space<vmem>>, vector<72x512xf32>
    %cst_84 = arith.constant dense<0.000000e+00> : vector<8x512xf32>
    %119 = tpu.matmul %117, %118, %cst_84 {dimension_numbers = #tpu.dot_dimension_numbers<[1], [0], [0], [1], [0, 0, 1, 1], [], []>} : vector<8x72xf32>, vector<72x512xf32>, vector<8x512xf32> -> vector<8x512xf32>
    %c0_85 = arith.constant 0 : index
    %c0_86 = arith.constant 0 : index
    %120 = vector.load %arg6[%c0_85, %c0_86] : memref<8x1xf32, #tpu.memory_space<vmem>>, vector<8x1xf32>
    %c0_87 = arith.constant 0 : index
    %c0_88 = arith.constant 0 : index
    %121 = vector.load %arg7[%c0_87, %c0_88] : memref<8x1xf32, #tpu.memory_space<vmem>>, vector<8x1xf32>
    %cst_89 = arith.constant dense<0.000000e+00> : vector<8xf32>
    %122 = vector.multi_reduction <add>, %119, %cst_89 [1] : vector<8x512xf32> to vector<8xf32>
    %123 = vector.shape_cast %122 : vector<8xf32> to vector<8x1xf32>
    %124 = arith.mulf %119, %119 : vector<8x512xf32>
    %cst_90 = arith.constant dense<0.000000e+00> : vector<8xf32>
    %125 = vector.multi_reduction <add>, %124, %cst_90 [1] : vector<8x512xf32> to vector<8xf32>
    %126 = vector.shape_cast %125 : vector<8xf32> to vector<8x1xf32>
    %cst_91 = arith.constant 0.001953125 : f32
    %127 = vector.broadcast %cst_91 : f32 to vector<8x1xf32>
    %128 = arith.mulf %123, %127 : vector<8x1xf32>
    %cst_92 = arith.constant 0.001953125 : f32
    %129 = vector.broadcast %cst_92 : f32 to vector<8x1xf32>
    %130 = arith.mulf %126, %129 : vector<8x1xf32>
    %131 = arith.mulf %128, %128 : vector<8x1xf32>
    %132 = arith.subf %130, %131 : vector<8x1xf32>
    %cst_93 = arith.constant 9.99999974E-6 : f32
    %133 = vector.broadcast %cst_93 : f32 to vector<8x1xf32>
    %134 = arith.addf %132, %133 : vector<8x1xf32>
    %135 = math.rsqrt %134 : vector<8x1xf32>
    %136 = arith.mulf %120, %135 : vector<8x1xf32>
    %137 = arith.mulf %128, %136 : vector<8x1xf32>
    %138 = arith.subf %121, %137 : vector<8x1xf32>
    %139 = vector.broadcast %136 : vector<8x1xf32> to vector<8x512xf32>
    %140 = arith.mulf %119, %139 : vector<8x512xf32>
    %141 = vector.broadcast %138 : vector<8x1xf32> to vector<8x512xf32>
    %142 = arith.addf %140, %141 : vector<8x512xf32>
    %143 = arith.addf %142, %0 : vector<8x512xf32>
    %cst_94 = arith.constant 0.000000e+00 : f32
    %144 = vector.broadcast %cst_94 : f32 to vector<8x512xf32>
    %145 = arith.maximumf %143, %144 : vector<8x512xf32>
    %c0_95 = arith.constant 0 : index
    %c0_96 = arith.constant 0 : index
    %146 = vector.load %arg8[%c0_95, %c0_96] : memref<8x512xf32, #tpu.memory_space<vmem>>, vector<8x512xf32>
    tpu.vector_store %arg8[%c0_95, %c0_96], %145 {strides = array<i32>} : memref<8x512xf32, #tpu.memory_space<vmem>>, vector<8x512xf32>,
    return
  }
}

</mosaic_0001>

<bundles_post_ra>
// kernel: tpu_custom_call.1
= control target key start
LH: loop header
LB: loop body
LE: loop exit
PB: predicated region body
PF: predicated region fallthrough
CT: control target
= control target key end

     0   :  { %13 = vsyncpa [#allocation4], 0  ;;  %s1987_s0 = inlined_call_operand.vmem [shape: f32[8,512], index: 0, kind: input, shape index: {}]   ;;  %s1988_s1 = inlined_call_operand.hbm [shape: f32[9,512], index: 1, kind: input, shape index: {}]   ;;  %s1989_s2 = inlined_call_operand.vmem [shape: f32[8,72], index: 2, kind: input, shape index: {}]   ;;  %s1990_s3 = inlined_call_operand.hbm [shape: f32[8,72], index: 3, kind: input, shape index: {}]   ;;  %s1991_s4 = inlined_call_operand.vmem [shape: f32[8,1], index: 4, kind: input, shape index: {}]   ;;  %s1992_s5 = inlined_call_operand.vmem [shape: f32[8,1], index: 5, kind: input, shape index: {}]   ;;  %s1993_s6 = inlined_call_operand.vmem [shape: f32[8,1], index: 6, kind: input, shape index: {}]   ;;  %s1994_s7 = inlined_call_operand.vmem [shape: f32[8,1], index: 7, kind: input, shape index: {}]   ;;  %s1995_s8 = inlined_call_operand.hbm [shape: f32[8,512], index: 8, kind: output, shape index: {}]  }
   0x1   :  { %14 = vsyncpa [#allocation7], 0 }
   0x2   :  { %15 = vsyncpa [#allocation5], 0  ;;  %s1458_s27 = smov [#allocation3]   ;;  %s1386_s9 = scalar_lea.hbm %s1988_s1, 1024 }
   0x3   :  { %s23_s28 = sshll.u32 %s1458_s27, 4  ;;  %p1387_p0 = scmp.ne.s32.totalorder %s1988_s1, %s1386_s9  ;;  %s24_s28 = int_to_ptr.vmem [resolvable:$true] %s23_s28 }
   0x4   :  { %p1390_p1 = scmp.lt.u32.totalorder %s1386_s9, %s1988_s1 }
   0x6   :  { %p1392_p2 = pnand %p1390_p1, %p1387_p0 }
   0x8   :  { %1395 = shalt.err (!%p1392_p2)
}
   0x9   :  { %s1396_s14 = scalar_lea.vmem %s24_s28, 1024  ;;  %p1401_p4 = scmp.lt.s32.totalorder %s24_s28, %s24_s28 }
   0xa   :  { %p1397_p3 = scmp.ne.s32.totalorder %s24_s28, %s1396_s14  ;;  %p1402_p5 = scmp.lt.s32.totalorder %s1396_s14, %s1396_s14 }
   0xc   :  { %p1403_p6 = por %p1402_p5, %p1401_p4 }
   0xe   :  { %p1404_p7 = pnand %p1403_p6, %p1397_p3 }
  0x10   :  { %1407 = shalt.err (!%p1404_p7)
}
  0x11   :  { %s1459_s15 = smov 512   ;;  %s1460_s16 = smov 32  }
  0x12   :  { %29 = dma.hbm_to_vmem [thread:$0]  %s1988_s1, 1024, %s24_s28, [#allocation4], %s1459_s15, %s1459_s15, %s1460_s16  }
  0x13   :  { %s1461_s19 = smov [#allocation6]   ;;  %s1408_s23 = scalar_lea.hbm %s1990_s3, 128 }
  0x14   :  { %s38_s20 = sshll.u32 %s1461_s19, 4  ;;  %p1409_p8 = scmp.ne.s32.totalorder %s1990_s3, %s1408_s23  ;;  %s39_s20 = int_to_ptr.vmem [resolvable:$true] %s38_s20 }
  0x15   :  { %p1412_p9 = scmp.lt.u32.totalorder %s1408_s23, %s1990_s3 }
  0x17   :  { %p1414_p10 = pnand %p1412_p9, %p1409_p8 }
  0x19   :  { %1417 = shalt.err (!%p1414_p10)
}
  0x1a   :  { %s1418_s29 = scalar_lea.vmem %s39_s20, 128  ;;  %p1423_p12 = scmp.lt.s32.totalorder %s39_s20, %s39_s20 }
  0x1b   :  { %p1419_p11 = scmp.ne.s32.totalorder %s39_s20, %s1418_s29  ;;  %p1424_p13 = scmp.lt.s32.totalorder %s1418_s29, %s1418_s29 }
  0x1d   :  { %p1425_p0 = por %p1424_p13, %p1423_p12 }
  0x1f   :  { %p1426_p1 = pnand %p1425_p0, %p1419_p11 }
  0x21   :  { %1429 = shalt.err (!%p1426_p1)
}
  0x22   :  { %41 = dma.hbm_to_vmem [thread:$0]  %s1990_s3, 128, %s39_s20, [#allocation7]  }
  0x23   :  { %1452 = dma.done.wait [#allocation4], 1024  }
  0x24   :  { %1453 = vsyncadd [#allocation4], 4294966272 }
  0x25   :  { %1454 = dma.done.wait [#allocation7], 128  }
  0x26   :  { %1455 = vsyncadd [#allocation7], 4294967168  ;;  %v1545_v0 = vld [vmem:[%s1987_s0] sm:$0xff]  ;;  %s1462_s10 = smov 16   ;;  %s1463_s11 = smov 17   ;;  %v1554_v1 = vld [vmem:[%s1987_s0 + $0x8] sm:$0xff]  ;;  %v68_v5 = vlaneseq }
  0x27   :  { %105 = vrot.lane.b32.xlu1 %v1545_v0, %s1462_s10  ;;  %60 = vrot.lane.b32.xlu0 %v1545_v0, %s1463_s11  ;;  %v1563_v2 = vld [vmem:[%s1987_s0 + $0x18] sm:$0xff]  ;;  %v1572_v3 = vld [vmem:[%s1987_s0 + $0x10] sm:$0xff]  ;;  %s1464_s17 = smov 15   ;;  %s1465_s18 = smov 1   ;;  %v1469_v4 = vmov 0.0   ;;  %vm481_vm8 = vcmask 588800  }
  0x28   :  { %s1466_s19 = smov 127   ;;  %s1467_s20 = smov 113   ;;  %549 = vmatprep.mubr.f32.mxu0 %v1469_v4  ;;  %620 = vmatprep.mubr.f32.mxu1 %v1469_v4  ;;  %v78_v6 = vshrl.u32 %v68_v5, 7  ;;  %v1628_v7 = vand.u32 127, %v68_v5 }
  0x29   :  { %s1468_s21 = smov 112   ;;  %s1470_s22 = smov 111   ;;  %v119_v9 = vld [vmem:[#allocation3 + $0x1] ss:$8 sm:$0xf] }
  0x2a   :  { %v1630_v8 = vsub.s32 1, %v78_v6  ;;  %v75_v10 = vld [vmem:[#allocation3] ss:$8 sm:$0xf]  ;;  %v1632_v13 = vsub.s32 0, %v78_v6  ;;  %vm113_vm0 = vcmp.lt.s32.totalorder %v1628_v7, 16 }
  0x2b   :  { %107 = vrot.lane.b32.xlu1 %v1554_v1, %s1462_s10  ;;  %62 = vrot.lane.b32.xlu0 %v1554_v1, %s1463_s11  ;;  %vm70_vm1 = vcmp.lt.s32.totalorder %v1628_v7, 17  ;;  %v1638_v18 = vsub.s32 2, %v78_v6  ;;  %v1640_v19 = vsub.s32 3, %v78_v6  ;;  %v163_v48 = vld [vmem:[#allocation3 + $0x2] ss:$8 sm:$0xf] }
  0x2c   :  { %v84_v14 = vrot.slane %v75_v10, %v1630_v8  ;;  %v128_v15 = vrot.slane %v119_v9, %v1630_v8  ;;  %v124_v22 = vrot.slane %v119_v9, %v1632_v13  ;;  %v80_v23 = vrot.slane %v75_v10, %v1632_v13  ;;  %v207_v49 = vld [vmem:[#allocation3 + $0x3] ss:$8 sm:$0xf] }
  0x2d   :  { %v132_v31 = vrot.slane %v119_v9, %v1638_v18  ;;  %v136_v32 = vrot.slane %v119_v9, %v1640_v19  ;;  %v88_v35 = vrot.slane %v75_v10, %v1638_v18  ;;  %v92_v36 = vrot.slane %v75_v10, %v1640_v19  ;;  %v238_v10 = vld [vmem:[#allocation3 + $0x4] ss:$8 sm:$0xf] }
  0x2e   :  { %vm157_vm2 = vcmp.lt.s32.totalorder %v1628_v7, 15  ;;  %v172_v54 = vrot.slane %v163_v48, %v1630_v8  ;;  %vm201_vm3 = vcmp.lt.s32.totalorder %v1628_v7, 1  ;;  %v216_v55 = vrot.slane %v207_v49, %v1630_v8 }
  0x2f   :  { %111 = vrot.lane.b32.xlu1 %v1563_v2, %s1462_s10  ;;  %66 = vrot.lane.b32.xlu0 %v1563_v2, %s1463_s11  ;;  %v212_v62 = vrot.slane %v207_v49, %v1632_v13  ;;  %v168_v63 = vrot.slane %v163_v48, %v1632_v13  ;;  %vm276_vm4 = vcmp.lt.s32.totalorder %v1628_v7, 127  ;;  %vm320_vm5 = vcmp.lt.s32.totalorder %v1628_v7, 113 }
  0x30   :  { %vm364_vm6 = vcmp.lt.s32.totalorder %v1628_v7, 112  ;;  %vm408_vm7 = vcmp.lt.s32.totalorder %v1628_v7, 111 }
  0x33   :  { %109 = vrot.lane.b32.xlu1 %v1572_v3, %s1462_s10  ;;  %64 = vrot.lane.b32.xlu0 %v1572_v3, %s1463_s11 }
  0x37   :  { %151 = vrot.lane.b32.xlu1 %v1554_v1, %s1464_s17  ;;  %149 = vrot.lane.b32.xlu0 %v1545_v0, %s1464_s17 }
  0x3b   :  { %195 = vrot.lane.b32.xlu1 %v1554_v1, %s1465_s18  ;;  %193 = vrot.lane.b32.xlu0 %v1545_v0, %s1465_s18 }
  0x3f   :  { %199 = vrot.lane.b32.xlu1 %v1563_v2, %s1465_s18  ;;  %155 = vrot.lane.b32.xlu0 %v1563_v2, %s1464_s17 }
  0x43   :  { %197 = vrot.lane.b32.xlu1 %v1572_v3, %s1465_s18  ;;  %153 = vrot.lane.b32.xlu0 %v1572_v3, %s1464_s17 }
  0x47   :  { %272 = vrot.lane.b32.xlu1 %v1572_v3, %s1466_s19  ;;  %270 = vrot.lane.b32.xlu0 %v1554_v1, %s1466_s19 }
  0x4b   :  { %274 = vrot.lane.b32.xlu1 %v1563_v2, %s1466_s19  ;;  %268 = vrot.lane.b32.xlu0 %v1545_v0, %s1466_s19 }
  0x4f   :  { %316 = vrot.lane.b32.xlu1 %v1572_v3, %s1467_s20  ;;  %314 = vrot.lane.b32.xlu0 %v1554_v1, %s1467_s20 }
  0x53   :  { %360 = vrot.lane.b32.xlu1 %v1572_v3, %s1468_s21  ;;  %358 = vrot.lane.b32.xlu0 %v1554_v1, %s1468_s21 }
  0x57   :  { %356 = vrot.lane.b32.xlu1 %v1545_v0, %s1468_s21  ;;  %312 = vrot.lane.b32.xlu0 %v1545_v0, %s1467_s20 }
  0x5b   :  { %362 = vrot.lane.b32.xlu1 %v1563_v2, %s1468_s21  ;;  %318 = vrot.lane.b32.xlu0 %v1563_v2, %s1467_s20 }
  0x5f   :  { %404 = vrot.lane.b32.xlu1 %v1572_v3, %s1470_s22  ;;  %402 = vrot.lane.b32.xlu0 %v1554_v1, %s1470_s22 }
  0x63   :  { %406 = vrot.lane.b32.xlu1 %v1563_v2, %s1470_s22  ;;  %400 = vrot.lane.b32.xlu0 %v1545_v0, %s1470_s22 }
  0x99   :  { %v106_v11 = vpop.permute.xlu1 %105  ;;  %v61_v12 = vpop.permute.xlu0 %60 }
  0x9d   :  { %v108_v16 = vpop.permute.xlu1 %107  ;;  %v63_v17 = vpop.permute.xlu0 %62 }
  0x9e   :  { %v116_v20 = vsel %vm113_vm0, %v106_v11, %v108_v16  ;;  %v73_v21 = vsel %vm70_vm1, %v61_v12, %v63_v17 }
  0x9f   :  { %v98_v24 = vmul.f32 %v84_v14, %v73_v21  ;;  %v142_v25 = vmul.f32 %v128_v15, %v116_v20  ;;  %v220_v14 = vrot.slane %v207_v49, %v1638_v18  ;;  %v224_v15 = vrot.slane %v207_v49, %v1640_v19 }
  0xa0   :  { %v176_v21 = vrot.slane %v163_v48, %v1638_v18 }
  0xa1   :  { %v112_v26 = vpop.permute.xlu1 %111  ;;  %v67_v27 = vpop.permute.xlu0 %66  ;;  %v1297_v28 = vpack.c.bf16 %v142_v25, %v98_v24 }
  0xa2   :  { %v117_v29 = vsel %vm113_vm0, %v112_v26, %v106_v11  ;;  %v74_v30 = vsel %vm70_vm1, %v67_v27, %v61_v12 }
  0xa3   :  { %v141_v33 = vmul.f32 %v124_v22, %v117_v29  ;;  %v97_v34 = vmul.f32 %v80_v23, %v74_v30  ;;  %1298 = vmatprep.subr.bf16.mxu0 %v1297_v28  ;;  %v180_v22 = vrot.slane %v163_v48, %v1640_v19  ;;  %v247_v23 = vrot.slane %v238_v10, %v1630_v8 }
  0xa5   :  { %v110_v37 = vpop.permute.xlu1 %109  ;;  %v65_v38 = vpop.permute.xlu0 %64  ;;  %v1299_v39 = vpack.c.bf16 %v141_v33, %v97_v34 }
  0xa6   :  { %v114_v40 = vsel %vm113_vm0, %v110_v37, %v112_v26  ;;  %v115_v41 = vsel %vm113_vm0, %v108_v16, %v110_v37  ;;  %v71_v42 = vsel %vm70_vm1, %v65_v38, %v67_v27  ;;  %v72_v43 = vsel %vm70_vm1, %v63_v17, %v65_v38  ;;  %v282_v16 = vld [vmem:[#allocation3 + $0x5] ss:$8 sm:$0xf] }
  0xa7   :  { %v143_v44 = vmul.f32 %v132_v31, %v115_v41  ;;  %v99_v45 = vmul.f32 %v88_v35, %v72_v43  ;;  %1300 = vmatpush1.bf16.msra.mxu0 %v1299_v39  ;;  %v100_v46 = vmul.f32 %v92_v36, %v71_v42  ;;  %v144_v47 = vmul.f32 %v136_v32, %v114_v40 }
  0xa8   :  { %v291_v27 = vrot.slane %v282_v16, %v1630_v8  ;;  %v261_v36 = vmul.f32 %v247_v23, %v1554_v1  ;;  %v243_v37 = vrot.slane %v238_v10, %v1632_v13  ;;  %v255_v42 = vrot.slane %v238_v10, %v1640_v19 }
  0xa9   :  { %v152_v50 = vpop.permute.xlu1 %151  ;;  %v150_v51 = vpop.permute.xlu0 %149  ;;  %v1313_v52 = vpack.c.bf16 %v144_v47, %v100_v46  ;;  %v1315_v53 = vpack.c.bf16 %v143_v44, %v99_v45  ;;  %v251_v43 = vrot.slane %v238_v10, %v1638_v18  ;;  %v295_v46 = vrot.slane %v282_v16, %v1638_v18 }
  0xaa   :  { %v160_v56 = vsel %vm157_vm2, %v150_v51, %v152_v50  ;;  %v287_v47 = vrot.slane %v282_v16, %v1632_v13  ;;  %v299_v1 = vrot.slane %v282_v16, %v1640_v19 }
  0xab   :  { %1314 = vmatprep.subr.bf16.mxu1 %v1313_v52  ;;  %v186_v60 = vmul.f32 %v172_v54, %v160_v56  ;;  %v263_v52 = vmul.f32 %v255_v42, %v1563_v2 }
  0xac   :  { %1316 = vmatpush1.bf16.msra.mxu1 %v1315_v53  ;;  %v262_v53 = vmul.f32 %v251_v43, %v1572_v3 }
  0xad   :  { %v196_v57 = vpop.permute.xlu1 %195  ;;  %v194_v58 = vpop.permute.xlu0 %193 }
  0xae   :  { %v204_v59 = vsel %vm201_vm3, %v194_v58, %v196_v57 }
  0xaf   :  { %v230_v61 = vmul.f32 %v216_v55, %v204_v59 }
  0xb1   :  { %v200_v5 = vpop.permute.xlu1 %199  ;;  %v156_v6 = vpop.permute.xlu0 %155  ;;  %v1301_v9 = vpack.c.bf16 %v230_v61, %v186_v60  ;;  %v326_v60 = vld [vmem:[#allocation3 + $0x6] ss:$8 sm:$0xf]  ;;  %v370_v61 = vld [vmem:[#allocation3 + $0x7] ss:$8 sm:$0xf] }
  0xb2   :  { %v205_v11 = vsel %vm201_vm3, %v200_v5, %v194_v58  ;;  %v161_v12 = vsel %vm157_vm2, %v156_v6, %v150_v51  ;;  %v260_v51 = vmul.f32 %v243_v37, %v1545_v0  ;;  %v375_v16 = vrot.slane %v370_v61, %v1632_v13 }
  0xb3   :  { %v229_v17 = vmul.f32 %v212_v62, %v205_v11  ;;  %v185_v20 = vmul.f32 %v168_v63, %v161_v12  ;;  %1302 = vmatprep.subr.bf16.mxu0 %v1301_v9 }
  0xb5   :  { %v198_v24 = vpop.permute.xlu1 %197  ;;  %v154_v25 = vpop.permute.xlu0 %153  ;;  %v1303_v26 = vpack.c.bf16 %v229_v17, %v185_v20  ;;  %v331_v17 = vrot.slane %v326_v60, %v1632_v13 }
  0xb6   :  { %v202_v28 = vsel %vm201_vm3, %v198_v24, %v200_v5  ;;  %v203_v29 = vsel %vm201_vm3, %v196_v57, %v198_v24  ;;  %v158_v30 = vsel %vm157_vm2, %v154_v25, %v156_v6  ;;  %v159_v31 = vsel %vm157_vm2, %v152_v50, %v154_v25 }
  0xb7   :  { %v231_v32 = vmul.f32 %v220_v14, %v203_v29  ;;  %v232_v33 = vmul.f32 %v224_v15, %v202_v28  ;;  %v187_v34 = vmul.f32 %v176_v21, %v159_v31  ;;  %v188_v35 = vmul.f32 %v180_v22, %v158_v30  ;;  %1304 = vmatpush1.bf16.msra.mxu0 %v1303_v26 }
  0xb8   :  { %v335_v5 = vrot.slane %v326_v60, %v1630_v8  ;;  %v379_v6 = vrot.slane %v370_v61, %v1630_v8  ;;  %v383_v25 = vrot.slane %v370_v61, %v1638_v18  ;;  %v387_v26 = vrot.slane %v370_v61, %v1640_v19 }
  0xb9   :  { %v273_v38 = vpop.permute.xlu1 %272  ;;  %v271_v39 = vpop.permute.xlu0 %270  ;;  %v1317_v40 = vpack.c.bf16 %v232_v33, %v188_v35  ;;  %v1319_v41 = vpack.c.bf16 %v231_v32, %v187_v34  ;;  %v339_v30 = vrot.slane %v326_v60, %v1638_v18  ;;  %v343_v31 = vrot.slane %v326_v60, %v1640_v19  ;;  %v444_v60 = vld [vmem:[%s1989_s2] sm:$0xff] }
  0xba   :  { %v278_v44 = vsel %vm276_vm4, %v271_v39, %v273_v38 }
  0xbb   :  { %v305_v45 = vmul.f32 %v291_v27, %v278_v44  ;;  %1318 = vmatprep.subr.bf16.mxu1 %v1317_v40  ;;  %v414_v27 = vld [vmem:[#allocation3 + $0x20] ss:$8 sm:$0xf] }
  0xbc   :  { %1320 = vmatpush1.bf16.msra.mxu1 %v1319_v41  ;;  %v423_v35 = vrot.slane %v414_v27, %v1630_v8 }
  0xbd   :  { %v275_v48 = vpop.permute.xlu1 %274  ;;  %v269_v49 = vpop.permute.xlu0 %268  ;;  %v1305_v50 = vpack.c.bf16 %v305_v45, %v261_v36 }
  0xbe   :  { %v277_v54 = vsel %vm276_vm4, %v273_v38, %v275_v48  ;;  %v279_v55 = vsel %vm276_vm4, %v269_v49, %v271_v39  ;;  %v280_v56 = vsel %vm276_vm4, %v275_v48, %v269_v49  ;;  %v427_v49 = vrot.slane %v414_v27, %v1638_v18 }
  0xbf   :  { %v306_v57 = vmul.f32 %v295_v46, %v277_v54  ;;  %v304_v58 = vmul.f32 %v287_v47, %v279_v55  ;;  %v307_v59 = vmul.f32 %v299_v1, %v280_v56  ;;  %1306 = vmatprep.subr.bf16.mxu0 %v1305_v50  ;;  %v419_v50 = vrot.slane %v414_v27, %v1632_v13 }
  0xc1   :  { %v317_v0 = vpop.permute.xlu1 %316  ;;  %v315_v2 = vpop.permute.xlu0 %314  ;;  %v1307_v3 = vpack.c.bf16 %v304_v58, %v260_v51  ;;  %v1321_v62 = vpack.c.bf16 %v307_v59, %v263_v52  ;;  %v1323_v63 = vpack.c.bf16 %v306_v57, %v262_v53  ;;  %v431_v51 = vrot.slane %v414_v27, %v1640_v19 }
  0xc2   :  { %v322_v9 = vsel %vm320_vm5, %v315_v2, %v317_v0 }
  0xc3   :  { %1308 = vmatpush1.bf16.msra.mxu0 %v1307_v3  ;;  %1322 = vmatprep.subr.bf16.mxu1 %v1321_v62  ;;  %v349_v14 = vmul.f32 %v335_v5, %v322_v9 }
  0xc4   :  { %1324 = vmatpush1.bf16.msra.mxu1 %v1323_v63 }
  0xc5   :  { %v361_v10 = vpop.permute.xlu1 %360  ;;  %v359_v11 = vpop.permute.xlu0 %358 }
  0xc6   :  { %v366_v12 = vsel %vm364_vm6, %v359_v11, %v361_v10 }
  0xc7   :  { %v393_v15 = vmul.f32 %v379_v6, %v366_v12 }
  0xc9   :  { %v357_v20 = vpop.permute.xlu1 %356  ;;  %v313_v21 = vpop.permute.xlu0 %312  ;;  %v1309_v22 = vpack.c.bf16 %v393_v15, %v349_v14 }
  0xca   :  { %v367_v23 = vsel %vm364_vm6, %v357_v20, %v359_v11  ;;  %v323_v24 = vsel %vm320_vm5, %v313_v21, %v315_v2 }
  0xcb   :  { %v392_v28 = vmul.f32 %v375_v16, %v367_v23  ;;  %v348_v29 = vmul.f32 %v331_v17, %v323_v24  ;;  %1310 = vmatprep.subr.bf16.mxu0 %v1309_v22  ;;  %v1471_v16 = vmov 0  }
  0xcc   :  { %1376 = vset.pattern.permute.xlu0 %v1471_v16  ;;  %1377 = vset.pattern.permute.xlu1 %v1471_v16 }
  0xcd   :  { %v363_v32 = vpop.permute.xlu1 %362  ;;  %v319_v33 = vpop.permute.xlu0 %318  ;;  %v1311_v34 = vpack.c.bf16 %v392_v28, %v348_v29  ;;  %v628_v28 = vld [vmem:[%s1992_s5] sm:$0xff] }
  0xce   :  { %v365_v36 = vsel %vm364_vm6, %v361_v10, %v363_v32  ;;  %v368_v37 = vsel %vm364_vm6, %v363_v32, %v357_v20  ;;  %v321_v38 = vsel %vm320_vm5, %v317_v0, %v319_v33  ;;  %v324_v39 = vsel %vm320_vm5, %v319_v33, %v313_v21 }
  0xcf   :  { %v394_v40 = vmul.f32 %v383_v25, %v365_v36  ;;  %v395_v41 = vmul.f32 %v387_v26, %v368_v37  ;;  %v350_v42 = vmul.f32 %v339_v30, %v321_v38  ;;  %v351_v43 = vmul.f32 %v343_v31, %v324_v39  ;;  %1312 = vmatpush1.bf16.msra.mxu0 %v1311_v34  ;;  %v627_v25 = vld [vmem:[%s1991_s4] sm:$0xff] }
  0xd1   :  { %v405_v44 = vpop.permute.xlu1 %404  ;;  %v403_v45 = vpop.permute.xlu0 %402  ;;  %v1325_v46 = vpack.c.bf16 %v395_v41, %v351_v43  ;;  %v1327_v47 = vpack.c.bf16 %v394_v40, %v350_v42 }
  0xd2   :  { %v410_v1 = vsel %vm408_vm7, %v403_v45, %v405_v44 }
  0xd3   :  { %v437_v48 = vmul.f32 %v423_v35, %v410_v1  ;;  %1326 = vmatprep.subr.bf16.mxu1 %v1325_v46 }
  0xd4   :  { %1328 = vmatpush1.bf16.msra.mxu1 %v1327_v47 }
  0xd5   :  { %v407_v52 = vpop.permute.xlu1 %406  ;;  %v401_v53 = vpop.permute.xlu0 %400  ;;  %501 = vmatprep.subr.mxu0 %v437_v48  ;;  %v686_v48 = vld [vmem:[#allocation3] ss:$8 sm:$0xf] }
  0xd6   :  { %v409_v54 = vsel %vm408_vm7, %v405_v44, %v407_v52  ;;  %v411_v55 = vsel %vm408_vm7, %v401_v53, %v403_v45  ;;  %v412_v56 = vsel %vm408_vm7, %v407_v52, %v401_v53  ;;  %v695_v52 = vrot.slane %v686_v48, %v1630_v8 }
  0xd7   :  { %v438_v57 = vmul.f32 %v427_v49, %v409_v54  ;;  %v436_v58 = vmul.f32 %v419_v50, %v411_v55  ;;  %v439_v59 = vmul.f32 %v431_v51, %v412_v56  ;;  %v728_v49 = vld [vmem:[#allocation3 + $0x1] ss:$8 sm:$0xf] }
  0xd8   :  { %v737_v53 = vrot.slane %v728_v49, %v1630_v8 }
  0xd9   :  { %502 = vmatpush1.msra.mxu0 %v436_v58  ;;  %572 = vmatprep.subr.mxu1 %v439_v59 }
  0xda   :  { %1293 = vmatmul.mubr.msk.f32.vlgmr.msra.gmra.mrb[0].mxu0 %vm481_vm8, %v444_v60  ;;  %573 = vmatpush1.msra.mxu1 %v438_v57 }
  0xdb   :  { %1294 = vmatmul.mubr.msk.f32.vlgmr.msra.gmra.mrb[0].mxu1 %vm481_vm8, %v444_v60  ;;  %1144 = vmatprep.mubr.f32.mxu0 %v1469_v4 }
  0xdc   :  { %1215 = vmatprep.mubr.f32.mxu1 %v1469_v4 }
 0x1ad   :  { %v551_v61 = vpop.f32.mrb[0].mxu0 }
 0x1ae   :  { %v634_v0 = vmul.f32 %v551_v61, %v551_v61  ;;  %v553_v2 = vpop.f32.mrb[1].mxu0  ;;  %v622_v3 = vpop.f32.mrb[0].mxu1 }
 0x1af   :  { %v629_v62 = vadd.f32 %v553_v2, %v551_v61  ;;  %v635_v63 = vmul.f32 %v553_v2, %v553_v2  ;;  %v636_v5 = vmul.f32 %v622_v3, %v622_v3  ;;  %v624_v6 = vpop.f32.mrb[1].mxu1 }
 0x1b0   :  { %v637_v12 = vmul.f32 %v624_v6, %v624_v6 }
 0x1b1   :  { %v630_v9 = vadd.f32 %v629_v62, %v622_v3  ;;  %v638_v10 = vadd.f32 %v635_v63, %v634_v0 }
 0x1b3   :  { %v631_v11 = vadd.f32 %v630_v9, %v624_v6  ;;  %v639_v14 = vadd.f32 %v638_v10, %v636_v5  ;;  %v699_v5 = vrot.slane %v686_v48, %v1638_v18 }
 0x1b5   :  { %632 = vadd.xlane.f32.xlu0 %v631_v11  ;;  %v640_v15 = vadd.f32 %v639_v14, %v637_v12  ;;  %v741_v12 = vrot.slane %v728_v49, %v1638_v18  ;;  %v745_v14 = vrot.slane %v728_v49, %v1640_v19 }
 0x1b7   :  { %641 = vadd.xlane.f32.xlu1 %v640_v15 }
 0x242   :  { %v633_v4 = vpop.xlane.xlu0 %632 }
 0x243   :  { %v643_v17 = vmul.f32 0.001953125, %v633_v4 }
 0x244   :  { %v642_v20 = vpop.xlane.xlu1 %641 }
 0x245   :  { %v645_v21 = vmul.f32 %v643_v17, %v643_v17  ;;  %v644_v22 = vmul.f32 0.001953125, %v642_v20 }
 0x247   :  { %v646_v23 = vsub.f32 %v644_v22, %v645_v21 }
 0x249   :  { %v647_v24 = vadd.f32 1e-05, %v646_v23 }
 0x24b   :  { %1378 = vrsqrt.f32 %v647_v24 }
 0x255   :  { %v1379_v26 = vpop.eup %1378 }
 0x256   :  { %v649_v27 = vmul.f32 %v1379_v26, %v627_v25 }
 0x258   :  { %654 = vperm.xlu0 %1376, %v649_v27   ;;  %v650_v29 = vmul.f32 %v649_v27, %v643_v17  ;;  %v812_v27 = vld [vmem:[#allocation3 + $0x3] ss:$8 sm:$0xf] }
 0x25a   :  { %v651_v30 = vsub.f32 %v628_v28, %v650_v29 }
 0x25c   :  { %663 = vperm.xlu1 %1377, %v651_v30  }
 0x2d7   :  { %v655_v31 = vpop.permute.xlu0 %654 }
 0x2d8   :  { %v657_v32 = vmul.f32 %v655_v31, %v551_v61  ;;  %v659_v33 = vmul.f32 %v655_v31, %v622_v3  ;;  %v658_v35 = vmul.f32 %v655_v31, %v553_v2  ;;  %v660_v42 = vmul.f32 %v655_v31, %v624_v6  ;;  %v770_v31 = vld [vmem:[#allocation3 + $0x2] ss:$8 sm:$0xf] }
 0x2d9   :  { %v691_v2 = vrot.slane %v686_v48, %v1632_v13  ;;  %v733_v3 = vrot.slane %v728_v49, %v1632_v13  ;;  %v703_v6 = vrot.slane %v686_v48, %v1640_v19 }
 0x2db   :  { %v664_v34 = vpop.permute.xlu1 %663 }
 0x2dc   :  { %v666_v36 = vadd.f32 %v664_v34, %v657_v32  ;;  %v668_v37 = vadd.f32 %v664_v34, %v659_v33  ;;  %v667_v38 = vadd.f32 %v664_v34, %v658_v35  ;;  %v669_v43 = vadd.f32 %v664_v34, %v660_v42 }
 0x2dd   :  { %v779_v33 = vrot.slane %v770_v31, %v1630_v8  ;;  %v821_v34 = vrot.slane %v812_v27, %v1630_v8 }
 0x2de   :  { %v1763_v39 = vmax.f32 %v666_v36, 0.0  ;;  %v1765_v40 = vmax.f32 %v668_v37, 0.0  ;;  %v1771_v41 = vmax.f32 %v667_v38, 0.0  ;;  %v1781_v44 = vmax.f32 %v669_v43, 0.0 }
 0x2df   :  { %v775_v38 = vrot.slane %v770_v31, %v1632_v13 }
 0x2e0   :  { %678 = vrot.lane.b32.xlu0 %v1765_v40, %s1463_s11  ;;  %674 = vrot.lane.b32.xlu1 %v1763_v39, %s1463_s11 }
 0x2e4   :  { %758 = vrot.lane.b32.xlu0 %v1763_v39, %s1464_s17  ;;  %676 = vrot.lane.b32.xlu1 %v1771_v41, %s1463_s11 }
 0x2e8   :  { %800 = vrot.lane.b32.xlu0 %v1763_v39, %s1465_s18  ;;  %716 = vrot.lane.b32.xlu1 %v1763_v39, %s1462_s10 }
 0x2ec   :  { %764 = vrot.lane.b32.xlu0 %v1781_v44, %s1464_s17  ;;  %718 = vrot.lane.b32.xlu1 %v1771_v41, %s1462_s10 }
 0x2f0   :  { %762 = vrot.lane.b32.xlu0 %v1765_v40, %s1464_s17  ;;  %680 = vrot.lane.b32.xlu1 %v1781_v44, %s1463_s11 }
 0x2f4   :  { %874 = vrot.lane.b32.xlu0 %v1771_v41, %s1466_s19  ;;  %722 = vrot.lane.b32.xlu1 %v1781_v44, %s1462_s10 }
 0x2f8   :  { %872 = vrot.lane.b32.xlu0 %v1763_v39, %s1466_s19  ;;  %720 = vrot.lane.b32.xlu1 %v1765_v40, %s1462_s10 }
 0x2fc   :  { %916 = vrot.lane.b32.xlu0 %v1771_v41, %s1467_s20  ;;  %760 = vrot.lane.b32.xlu1 %v1771_v41, %s1464_s17 }
 0x300   :  { %958 = vrot.lane.b32.xlu0 %v1771_v41, %s1468_s21  ;;  %802 = vrot.lane.b32.xlu1 %v1771_v41, %s1465_s18 }
 0x304   :  { %914 = vrot.lane.b32.xlu0 %v1763_v39, %s1467_s20  ;;  %806 = vrot.lane.b32.xlu1 %v1781_v44, %s1465_s18 }
 0x308   :  { %920 = vrot.lane.b32.xlu0 %v1781_v44, %s1467_s20  ;;  %804 = vrot.lane.b32.xlu1 %v1765_v40, %s1465_s18 }
 0x30c   :  { %1000 = vrot.lane.b32.xlu0 %v1771_v41, %s1470_s22  ;;  %876 = vrot.lane.b32.xlu1 %v1765_v40, %s1466_s19 }
 0x310   :  { %998 = vrot.lane.b32.xlu0 %v1763_v39, %s1470_s22  ;;  %878 = vrot.lane.b32.xlu1 %v1781_v44, %s1466_s19 }
 0x314   :  { %918 = vrot.lane.b32.xlu1 %v1765_v40, %s1467_s20 }
 0x318   :  { %960 = vrot.lane.b32.xlu1 %v1765_v40, %s1468_s21 }
 0x31c   :  { %956 = vrot.lane.b32.xlu1 %v1763_v39, %s1468_s21 }
 0x320   :  { %962 = vrot.lane.b32.xlu1 %v1781_v44, %s1468_s21 }
 0x324   :  { %1002 = vrot.lane.b32.xlu1 %v1765_v40, %s1470_s22 }
 0x328   :  { %1004 = vrot.lane.b32.xlu1 %v1781_v44, %s1470_s22 }
 0x352   :  { %v679_v45 = vpop.permute.xlu0 %678  ;;  %v675_v46 = vpop.permute.xlu1 %674 }
 0x356   :  { %v759_v47 = vpop.permute.xlu0 %758  ;;  %v677_v1 = vpop.permute.xlu1 %676 }
 0x357   :  { %v684_v54 = vsel %vm70_vm1, %v675_v46, %v677_v1  ;;  %v683_v15 = vsel %vm70_vm1, %v677_v1, %v679_v45 }
 0x358   :  { %v709_v58 = vmul.f32 %v695_v52, %v684_v54  ;;  %v710_v23 = vmul.f32 %v699_v5, %v683_v15  ;;  %v842_v52 = vld [vmem:[#allocation3 + $0x4] ss:$8 sm:$0xf]  ;;  %v783_v54 = vrot.slane %v770_v31, %v1638_v18 }
 0x35a   :  { %v1835_v50 = vpop.permute.xlu0 %800  ;;  %v717_v51 = vpop.permute.xlu1 %716 }
 0x35e   :  { %v765_v55 = vpop.permute.xlu0 %764  ;;  %v719_v56 = vpop.permute.xlu1 %718 }
 0x35f   :  { %v726_v57 = vsel %vm113_vm0, %v717_v51, %v719_v56 }
 0x360   :  { %v751_v59 = vmul.f32 %v737_v53, %v726_v57  ;;  %v884_v53 = vld [vmem:[#allocation3 + $0x5] ss:$8 sm:$0xf]  ;;  %v825_v57 = vrot.slane %v812_v27, %v1638_v18 }
 0x362   :  { %v681_v60 = vpop.permute.xlu1 %680  ;;  %v1329_v61 = vpack.c.bf16 %v751_v59, %v709_v58  ;;  %v763_v0 = vpop.permute.xlu0 %762 }
 0x363   :  { %v685_v62 = vsel %vm70_vm1, %v681_v60, %v675_v46  ;;  %v682_v16 = vsel %vm70_vm1, %v679_v45, %v681_v60  ;;  %v817_v45 = vrot.slane %v812_v27, %v1632_v13  ;;  %v769_v46 = vsel %vm157_vm2, %v765_v55, %v759_v47 }
 0x364   :  { %1330 = vmatprep.subr.bf16.mxu0 %v1329_v61  ;;  %v708_v10 = vmul.f32 %v691_v2, %v685_v62  ;;  %v711_v24 = vmul.f32 %v703_v6, %v682_v16  ;;  %v792_v58 = vmul.f32 %v775_v38, %v769_v46  ;;  %v829_v60 = vrot.slane %v812_v27, %v1640_v19 }
 0x365   :  { %v889_v2 = vrot.slane %v884_v53, %v1632_v13 }
 0x366   :  { %v723_v63 = vpop.permute.xlu1 %722  ;;  %v1857_v4 = vpop.permute.xlu0 %874 }
 0x367   :  { %v727_v9 = vsel %vm113_vm0, %v723_v63, %v717_v51  ;;  %v787_v51 = vrot.slane %v770_v31, %v1640_v19 }
 0x368   :  { %v750_v11 = vmul.f32 %v733_v3, %v727_v9  ;;  %v893_v9 = vrot.slane %v884_v53, %v1630_v8 }
 0x36a   :  { %v1331_v17 = vpack.c.bf16 %v750_v11, %v708_v10  ;;  %v721_v20 = vpop.permute.xlu1 %720  ;;  %v1863_v32 = vpop.permute.xlu0 %872 }
 0x36b   :  { %v724_v21 = vsel %vm113_vm0, %v721_v20, %v723_v63  ;;  %v725_v22 = vsel %vm113_vm0, %v719_v56, %v721_v20  ;;  %v851_v63 = vrot.slane %v842_v52, %v1630_v8 }
 0x36c   :  { %v752_v25 = vmul.f32 %v741_v12, %v725_v22  ;;  %v753_v26 = vmul.f32 %v745_v14, %v724_v21  ;;  %1332 = vmatpush1.bf16.msra.mxu0 %v1331_v17  ;;  %v847_v14 = vrot.slane %v842_v52, %v1632_v13  ;;  %v855_v22 = vrot.slane %v842_v52, %v1638_v18 }
 0x36d   :  { %v865_v27 = vmul.f32 %v851_v63, %v1771_v41 }
 0x36e   :  { %v1347_v28 = vpack.c.bf16 %v752_v25, %v710_v23  ;;  %v761_v29 = vpop.permute.xlu1 %760  ;;  %v1345_v30 = vpack.c.bf16 %v753_v26, %v711_v24  ;;  %v1876_v1 = vpop.permute.xlu0 %916  ;;  %v859_v23 = vrot.slane %v842_v52, %v1640_v19  ;;  %v897_v25 = vrot.slane %v884_v53, %v1638_v18 }
 0x36f   :  { %v768_v35 = vsel %vm157_vm2, %v759_v47, %v761_v29  ;;  %v766_v47 = vsel %vm157_vm2, %v763_v0, %v765_v55  ;;  %v767_v61 = vsel %vm157_vm2, %v761_v29, %v763_v0  ;;  %v882_v0 = vsel %vm276_vm4, %v1863_v32, %v1857_v4 }
 0x370   :  { %1346 = vmatprep.subr.bf16.mxu1 %v1345_v30  ;;  %v793_v42 = vmul.f32 %v779_v33, %v768_v35  ;;  %v794_v10 = vmul.f32 %v783_v54, %v767_v61  ;;  %v906_v20 = vmul.f32 %v889_v2, %v882_v0  ;;  %v901_v26 = vrot.slane %v884_v53, %v1640_v19 }
 0x371   :  { %1348 = vmatpush1.bf16.msra.mxu1 %v1347_v28  ;;  %v864_v28 = vmul.f32 %v847_v14, %v1763_v39  ;;  %v866_v35 = vmul.f32 %v855_v22, %v1765_v40  ;;  %v867_v41 = vmul.f32 %v859_v23, %v1781_v44  ;;  %v968_v39 = vld [vmem:[#allocation3 + $0x7] ss:$8 sm:$0xf] }
 0x372   :  { %v803_v36 = vpop.permute.xlu1 %802  ;;  %v959_v5 = vpop.permute.xlu0 %958  ;;  %v973_v54 = vrot.slane %v968_v39, %v1632_v13  ;;  %v985_v63 = vrot.slane %v968_v39, %v1640_v19 }
 0x373   :  { %v810_v37 = vsel %vm201_vm3, %v1835_v50, %v803_v36  ;;  %v1339_v33 = vpack.c.bf16 %v906_v20, %v864_v28  ;;  %v1040_v28 = vld [vmem:[#allocation6] sm:$0xff] }
 0x374   :  { %v835_v43 = vmul.f32 %v821_v34, %v810_v37 }
 0x376   :  { %v807_v48 = vpop.permute.xlu1 %806  ;;  %v1333_v49 = vpack.c.bf16 %v835_v43, %v793_v42  ;;  %v915_v29 = vpop.permute.xlu0 %914 }
 0x377   :  { %v811_v56 = vsel %vm201_vm3, %v807_v48, %v1835_v50  ;;  %v795_v50 = vmul.f32 %v787_v51, %v766_v47 }
 0x378   :  { %v834_v59 = vmul.f32 %v817_v45, %v811_v56  ;;  %1334 = vmatprep.subr.bf16.mxu0 %v1333_v49  ;;  %v926_v45 = vld [vmem:[#allocation3 + $0x6] ss:$8 sm:$0xf]  ;;  %v977_v49 = vrot.slane %v968_v39, %v1630_v8  ;;  %v924_v56 = vsel %vm320_vm5, %v915_v29, %v1876_v1 }
 0x379   :  { %v931_v51 = vrot.slane %v926_v45, %v1632_v13 }
 0x37a   :  { %v1335_v3 = vpack.c.bf16 %v834_v59, %v792_v58  ;;  %v805_v62 = vpop.permute.xlu1 %804  ;;  %v921_v46 = vpop.permute.xlu0 %920  ;;  %v943_v59 = vrot.slane %v926_v45, %v1640_v19 }
 0x37b   :  { %v808_v6 = vsel %vm201_vm3, %v805_v62, %v807_v48  ;;  %v809_v55 = vsel %vm201_vm3, %v803_v36, %v805_v62  ;;  %v935_v48 = vrot.slane %v926_v45, %v1630_v8  ;;  %v948_v2 = vmul.f32 %v931_v51, %v924_v56  ;;  %v1223_v56 = vld [vmem:[%s1994_s7] sm:$0xff] }
 0x37c   :  { %v836_v11 = vmul.f32 %v825_v57, %v809_v55  ;;  %v837_v12 = vmul.f32 %v829_v60, %v808_v6  ;;  %1336 = vmatpush1.bf16.msra.mxu0 %v1335_v3  ;;  %v939_v60 = vrot.slane %v926_v45, %v1638_v18  ;;  %v981_v62 = vrot.slane %v968_v39, %v1638_v18  ;;  %v1010_v6 = vld [vmem:[#allocation3 + $0x20] ss:$8 sm:$0xf] }
 0x37e   :  { %v1351_v15 = vpack.c.bf16 %v836_v11, %v794_v10  ;;  %v877_v16 = vpop.permute.xlu1 %876  ;;  %v1349_v17 = vpack.c.bf16 %v837_v12, %v795_v50  ;;  %v1001_v57 = vpop.permute.xlu0 %1000  ;;  %v1019_v11 = vrot.slane %v1010_v6, %v1630_v8  ;;  %v1023_v8 = vrot.slane %v1010_v6, %v1638_v18 }
 0x37f   :  { %v881_v21 = vsel %vm276_vm4, %v1857_v4, %v877_v16 }
 0x380   :  { %v907_v24 = vmul.f32 %v893_v9, %v881_v21  ;;  %1350 = vmatprep.subr.bf16.mxu1 %v1349_v17  ;;  %v1015_v17 = vrot.slane %v1010_v6, %v1632_v13 }
 0x381   :  { %1352 = vmatpush1.bf16.msra.mxu1 %v1351_v15 }
 0x382   :  { %v879_v30 = vpop.permute.xlu1 %878  ;;  %v1337_v31 = vpack.c.bf16 %v907_v24, %v865_v27  ;;  %v999_v0 = vpop.permute.xlu0 %998 }
 0x383   :  { %v880_v4 = vsel %vm276_vm4, %v877_v16, %v879_v30  ;;  %v883_v34 = vsel %vm276_vm4, %v879_v30, %v1863_v32  ;;  %v1008_v20 = vsel %vm408_vm7, %v999_v0, %v1001_v57 }
 0x384   :  { %v908_v36 = vmul.f32 %v897_v25, %v880_v4  ;;  %v909_v37 = vmul.f32 %v901_v26, %v883_v34  ;;  %1338 = vmatprep.subr.bf16.mxu0 %v1337_v31  ;;  %v1027_v26 = vrot.slane %v1010_v6, %v1640_v19  ;;  %v1032_v27 = vmul.f32 %v1015_v17, %v1008_v20  ;;  %v1382_v6 = vld [vmem:[%s1987_s0] sm:$0xff] }
 0x385   :  { %1340 = vmatpush1.bf16.msra.mxu0 %v1339_v33 }
 0x386   :  { %v1355_v38 = vpack.c.bf16 %v908_v36, %v866_v35  ;;  %v919_v42 = vpop.permute.xlu1 %918  ;;  %v1353_v43 = vpack.c.bf16 %v909_v37, %v867_v41 }
 0x387   :  { %v923_v40 = vsel %vm320_vm5, %v1876_v1, %v919_v42  ;;  %v925_v1 = vsel %vm320_vm5, %v921_v46, %v915_v29  ;;  %v922_v50 = vsel %vm320_vm5, %v919_v42, %v921_v46 }
 0x388   :  { %1354 = vmatprep.subr.bf16.mxu1 %v1353_v43  ;;  %v949_v52 = vmul.f32 %v935_v48, %v923_v40  ;;  %v951_v12 = vmul.f32 %v943_v59, %v925_v1  ;;  %v950_v14 = vmul.f32 %v939_v60, %v922_v50 }
 0x389   :  { %1356 = vmatpush1.bf16.msra.mxu1 %v1355_v38 }
 0x38a   :  { %v961_v32 = vpop.permute.xlu1 %960 }
 0x38b   :  { %v965_v44 = vsel %vm364_vm6, %v959_v5, %v961_v32 }
 0x38c   :  { %v991_v53 = vmul.f32 %v977_v49, %v965_v44 }
 0x38e   :  { %v957_v58 = vpop.permute.xlu1 %956  ;;  %v1341_v47 = vpack.c.bf16 %v991_v53, %v949_v52  ;;  %v1222_v52 = vld [vmem:[%s1993_s6] sm:$0xff]  ;;  %s1472_s6 = smov [#allocation8]  }
 0x38f   :  { %v966_v61 = vsel %vm364_vm6, %v957_v58, %v959_v5  ;;  %s1283_s28 = sshll.u32 %s1472_s6, 4  ;;  %s1284_s28 = int_to_ptr.vmem [resolvable:$true] %s1283_s28 }
 0x390   :  { %v990_v3 = vmul.f32 %v973_v54, %v966_v61  ;;  %1342 = vmatprep.subr.bf16.mxu0 %v1341_v47  ;;  %s1430_s14 = scalar_lea.vmem %s1284_s28, 512  ;;  %p1435_p3 = scmp.lt.s32.totalorder %s1284_s28, %s1284_s28 }
 0x391   :  { %p1431_p2 = scmp.ne.s32.totalorder %s1284_s28, %s1430_s14  ;;  %p1436_p4 = scmp.lt.s32.totalorder %s1430_s14, %s1430_s14 }
 0x392   :  { %v1343_v55 = vpack.c.bf16 %v990_v3, %v948_v2  ;;  %v963_v9 = vpop.permute.xlu1 %962 }
 0x393   :  { %v964_v5 = vsel %vm364_vm6, %v961_v32, %v963_v9  ;;  %v967_v10 = vsel %vm364_vm6, %v963_v9, %v957_v58  ;;  %v1383_v9 = vld [vmem:[%s1987_s0 + $0x8] sm:$0xff]  ;;  %p1437_p5 = por %p1436_p4, %p1435_p3 }
 0x394   :  { %v992_v15 = vmul.f32 %v981_v62, %v964_v5  ;;  %v993_v16 = vmul.f32 %v985_v63, %v967_v10  ;;  %1344 = vmatpush1.bf16.msra.mxu0 %v1343_v55  ;;  %v1384_v5 = vld [vmem:[%s1987_s0 + $0x10] sm:$0xff] }
 0x395   :  { %p1438_p6 = pnand %p1437_p5, %p1431_p2 }
 0x396   :  { %v1359_v21 = vpack.c.bf16 %v992_v15, %v950_v14  ;;  %v1003_v22 = vpop.permute.xlu1 %1002  ;;  %v1357_v23 = vpack.c.bf16 %v993_v16, %v951_v12 }
 0x397   :  { %v1007_v24 = vsel %vm408_vm7, %v1001_v57, %v1003_v22 }
 0x398   :  { %v1033_v25 = vmul.f32 %v1019_v11, %v1007_v24  ;;  %1358 = vmatprep.subr.bf16.mxu1 %v1357_v23  ;;  %v1385_v11 = vld [vmem:[%s1987_s0 + $0x18] sm:$0xff] }
 0x399   :  { %1360 = vmatpush1.bf16.msra.mxu1 %v1359_v21 }
 0x39a   :  { %v1005_v29 = vpop.permute.xlu1 %1004  ;;  %1096 = vmatprep.subr.mxu0 %v1033_v25 }
 0x39b   :  { %v1006_v13 = vsel %vm408_vm7, %v1003_v22, %v1005_v29  ;;  %v1009_v30 = vsel %vm408_vm7, %v1005_v29, %v999_v0  ;;  %1097 = vmatpush1.msra.mxu0 %v1032_v27 }
 0x39c   :  { %v1034_v31 = vmul.f32 %v1023_v8, %v1006_v13  ;;  %v1035_v33 = vmul.f32 %v1027_v26, %v1009_v30  ;;  %1295 = vmatmul.mubr.msk.f32.vlgmr.msra.gmra.mrb[2].mxu0 %vm481_vm8, %v1040_v28 }
 0x39e   :  { %1167 = vmatprep.subr.mxu1 %v1035_v33 }
 0x39f   :  { %1168 = vmatpush1.msra.mxu1 %v1034_v31 }
 0x3a0   :  { %1296 = vmatmul.mubr.msk.f32.vlgmr.msra.gmra.mrb[2].mxu1 %vm481_vm8, %v1040_v28 }
 0x46f   :  { %v1146_v18 = vpop.f32.mrb[2].mxu0 }
 0x470   :  { %v1229_v19 = vmul.f32 %v1146_v18, %v1146_v18  ;;  %v1148_v4 = vpop.f32.mrb[3].mxu0 }
 0x471   :  { %v1224_v34 = vadd.f32 %v1148_v4, %v1146_v18  ;;  %v1230_v35 = vmul.f32 %v1148_v4, %v1148_v4 }
 0x473   :  { %v1233_v36 = vadd.f32 %v1230_v35, %v1229_v19  ;;  %v1217_v37 = vpop.f32.mrb[2].mxu1 }
 0x474   :  { %v1231_v41 = vmul.f32 %v1217_v37, %v1217_v37  ;;  %v1219_v39 = vpop.f32.mrb[3].mxu1  ;;  %v1225_v7 = vadd.f32 %v1224_v34, %v1217_v37 }
 0x475   :  { %v1232_v38 = vmul.f32 %v1219_v39, %v1219_v39 }
 0x476   :  { %v1226_v42 = vadd.f32 %v1225_v7, %v1219_v39  ;;  %v1234_v43 = vadd.f32 %v1233_v36, %v1231_v41 }
 0x478   :  { %1227 = vadd.xlane.f32.xlu0 %v1226_v42  ;;  %v1235_v45 = vadd.f32 %v1234_v43, %v1232_v38 }
 0x47a   :  { %1236 = vadd.xlane.f32.xlu1 %v1235_v45 }
 0x505   :  { %v1228_v46 = vpop.xlane.xlu0 %1227 }
 0x506   :  { %v1238_v48 = vmul.f32 0.001953125, %v1228_v46 }
 0x507   :  { %v1237_v49 = vpop.xlane.xlu1 %1236 }
 0x508   :  { %v1240_v40 = vmul.f32 %v1238_v48, %v1238_v48  ;;  %v1239_v32 = vmul.f32 0.001953125, %v1237_v49 }
 0x50a   :  { %v1241_v44 = vsub.f32 %v1239_v32, %v1240_v40 }
 0x50c   :  { %v1242_v51 = vadd.f32 1e-05, %v1241_v44 }
 0x50e   :  { %1380 = vrsqrt.f32 %v1242_v51 }
 0x518   :  { %v1381_v53 = vpop.eup %1380 }
 0x519   :  { %v1244_v54 = vmul.f32 %v1381_v53, %v1222_v52 }
 0x51b   :  { %1249 = vperm.xlu0 %1376, %v1244_v54   ;;  %v1245_v57 = vmul.f32 %v1244_v54, %v1238_v48 }
 0x51d   :  { %v1246_v58 = vsub.f32 %v1223_v56, %v1245_v57 }
 0x51f   :  { %1258 = vperm.xlu1 %1377, %v1246_v58  }
 0x59a   :  { %v1250_v47 = vpop.permute.xlu0 %1249 }
 0x59b   :  { %v1252_v59 = vmul.f32 %v1250_v47, %v1146_v18  ;;  %v1253_v60 = vmul.f32 %v1250_v47, %v1148_v4  ;;  %v1254_v61 = vmul.f32 %v1250_v47, %v1217_v37  ;;  %v1255_v2 = vmul.f32 %v1250_v47, %v1219_v39 }
 0x59e   :  { %v1259_v3 = vpop.permute.xlu1 %1258 }
 0x59f   :  { %v1261_v62 = vadd.f32 %v1259_v3, %v1252_v59  ;;  %v1262_v63 = vadd.f32 %v1259_v3, %v1253_v60  ;;  %v1263_v1 = vadd.f32 %v1259_v3, %v1254_v61  ;;  %v1264_v50 = vadd.f32 %v1259_v3, %v1255_v2 }
 0x5a1   :  { %v1265_v55 = vadd.f32 %v1382_v6, %v1261_v62  ;;  %v1266_v0 = vadd.f32 %v1383_v9, %v1262_v63  ;;  %v1267_v10 = vadd.f32 %v1384_v5, %v1263_v1  ;;  %v1268_v12 = vadd.f32 %v1385_v11, %v1264_v50 }
 0x5a3   :  { %v1269_v14 = vmax.f32 %v1265_v55, 0.0  ;;  %v1270_v15 = vmax.f32 %v1266_v0, 0.0  ;;  %v1271_v16 = vmax.f32 %v1267_v10, 0.0  ;;  %v1272_v17 = vmax.f32 %v1268_v12, 0.0 }
 0x5a5   :  { %1273 = vst [vmem:[#allocation8] sm:$0xff] %v1269_v14  ;;  %1274 = vst [vmem:[#allocation8 + $0x8] sm:$0xff] %v1270_v15 }
 0x5a6   :  { %1275 = vst [vmem:[#allocation8 + $0x10] sm:$0xff] %v1271_v16  ;;  %1276 = vst [vmem:[#allocation8 + $0x18] sm:$0xff] %v1272_v17 }
 0x5a7   :  { %1441 = shalt.err (!%p1438_p6)
}
 0x5a8   :  { %s1442_s0 = scalar_lea.hbm %s1995_s8, 512 }
 0x5a9   :  { %p1443_p7 = scmp.ne.s32.totalorder %s1995_s8, %s1442_s0  ;;  %p1446_p8 = scmp.lt.u32.totalorder %s1442_s0, %s1995_s8 }
 0x5ab   :  { %p1448_p9 = pnand %p1446_p8, %p1443_p7 }
 0x5ad   :  { %1451 = shalt.err (!%p1448_p9)
}
 0x5ae   :  { %1286 = dma.vmem_to_hbm [thread:$0]  %s1284_s28, 512, %s1995_s8, [#allocation5]  }
 0x5af   :  { %1456 = dma.done.wait [#allocation5], 512  }
 0x5b0   :  { %1457 = vsyncadd [#allocation5], 4294966784 }
 0x5b1   :  { %1290 = vsyncpa [#allocation4], 1 }
 0x5b2   :  { %1291 = vsyncpa [#allocation7], 1 }
 0x5b3   :  { %1292 = vsyncpa [#allocation5], 1 }

</bundles_post_ra>
